<compile_context>
chip_gen: v5e
topology: v5e:2x2
jax: 0.10.0
libtpu: 0.0.40
codegen_flags: <defaults>
</compile_context>

<pallas_src>
import math

import jax
import jax.numpy as jnp
from jax.experimental import pallas as pl
from jax.experimental.pallas import tpu as pltpu

LANE = 128


def _round_up(a, b):
    return (a + b - 1) // b * b


def ffn_kernel(x_ref, w1_ref, b1_ref, w2_ref, b2_ref, o_ref, acc_ref):
    # x_ref:  (tm, Ep)  bf16 input rows (block index constant over the F axis)
    # w1_ref: (Ep, tf)  bf16 W1^T tile
    # b1_ref: (1, tf)   f32 bias-1 tile
    # w2_ref: (tf, Ep)  bf16 W2^T tile
    # b2_ref: (1, Ep)   f32 bias-2
    # o_ref:  (tm, Ep)  output tile (revisited across the F axis)
    # acc_ref:(tm, Ep)  f32 accumulator scratch
    f = pl.program_id(1)

    @pl.when(f == 0)
    def _init():
        acc_ref[...] = jnp.zeros_like(acc_ref)

    # linear_1 tile (MXU, f32 accumulation), bias + ReLU in f32 on the VPU.
    h = jnp.dot(x_ref[...], w1_ref[...], preferred_element_type=jnp.float32)
    h = jnp.maximum(h + b1_ref[...], 0.0)

    # dropout (eval mode) == identity
    # TODO(synk): training-mode dropout would need pltpu.prng_seed /
    # pltpu.prng_random_bits with a Bernoulli mask and 1/(1-p) scaling.

    # linear_2 partial product, accumulated over F tiles.
    acc_ref[...] += jnp.dot(h.astype(w2_ref.dtype), w2_ref[...],
                            preferred_element_type=jnp.float32)

    @pl.when(f == pl.num_programs(1) - 1)
    def _store():
        o_ref[...] = (acc_ref[...] + b2_ref[...]).astype(o_ref.dtype)


def prepare_ffn_params(w1, b1, w2, b2, *, compute_dtype=jnp.bfloat16):
    """One-time glue (keep OUT of the per-forward path): transpose the
    PyTorch (out, in) weights to row-major (in, out), pad E / F up to lane
    multiples of 128 (zero padding, mathematically a no-op) and cast the
    weights to the MXU compute dtype (bf16)."""
    F, E = w1.shape
    Ep, Fp = _round_up(E, LANE), _round_up(F, LANE)
    w1_t = jnp.zeros((Ep, Fp), compute_dtype).at[:E, :F].set(
        jnp.transpose(w1).astype(compute_dtype))
    w2_t = jnp.zeros((Fp, Ep), compute_dtype).at[:F, :E].set(
        jnp.transpose(w2).astype(compute_dtype))
    b1_p = jnp.zeros((1, Fp), jnp.float32).at[:, :F].set(
        b1.astype(jnp.float32)[None, :])
    b2_p = jnp.zeros((1, Ep), jnp.float32).at[:, :E].set(
        b2.astype(jnp.float32)[None, :])
    return dict(w1_t=w1_t, b1=b1_p, w2_t=w2_t, b2=b2_p, E=E, F=F)


def feed_forward_network(x, params, *, row_tile=256, f_tile=512):
    """x: (..., E). params: output of prepare_ffn_params (weights already
    transposed / padded / cast once)."""
    w1_t, b1_p = params["w1_t"], params["b1"]
    w2_t, b2_p = params["w2_t"], params["b2"]
    E = params["E"]
    Ep, Fp = w1_t.shape
    compute_dtype = w1_t.dtype

    orig_shape = x.shape
    assert orig_shape[-1] == E
    xn = x.reshape(-1, E)
    N = xn.shape[0]

    # Row tile: up to row_tile (multiple of 128); pad rows to a tile multiple.
    tm = min(_round_up(row_tile, LANE), _round_up(N, LANE))
    Np = _round_up(N, tm)
    # Hidden tile: largest multiple of 128 that divides Fp and is <= f_tile.
    tf = math.gcd(Fp, _round_up(f_tile, LANE))

    x_c = xn.astype(compute_dtype)
    if (Np, Ep) != (N, E):
        x_c = jnp.zeros((Np, Ep), compute_dtype).at[:N, :E].set(x_c)

    bytes_accessed = (
        x_c.size * x_c.dtype.itemsize
        + w1_t.size * w1_t.dtype.itemsize
        + w2_t.size * w2_t.dtype.itemsize
        + b1_p.size * b1_p.dtype.itemsize
        + b2_p.size * b2_p.dtype.itemsize
        + Np * Ep * x.dtype.itemsize)
    cost = pl.CostEstimate(flops=4 * Np * Ep * Fp, transcendentals=0,
                           bytes_accessed=int(bytes_accessed))

    out = pl.pallas_call(
        ffn_kernel,
        out_shape=jax.ShapeDtypeStruct((Np, Ep), x.dtype),
        grid_spec=pltpu.PrefetchScalarGridSpec(
            num_scalar_prefetch=0,
            grid=(Np // tm, Fp // tf),          # rows (parallel), F (reduction, last)
            in_specs=[
                pl.BlockSpec((tm, Ep), lambda i, f: (i, 0)),   # x row tile
                pl.BlockSpec((Ep, tf), lambda i, f: (0, f)),   # W1^T F-tile
                pl.BlockSpec((1, tf), lambda i, f: (0, f)),    # b1 F-tile
                pl.BlockSpec((tf, Ep), lambda i, f: (f, 0)),   # W2^T F-tile
                pl.BlockSpec((1, Ep), lambda i, f: (0, 0)),    # b2
            ],
            out_specs=pl.BlockSpec((tm, Ep), lambda i, f: (i, 0)),
            scratch_shapes=[pltpu.VMEM((tm, Ep), jnp.float32)],
        ),
        compiler_params=pltpu.CompilerParams(
            dimension_semantics=("parallel", "arbitrary"),
            vmem_limit_bytes=64 * 1024 * 1024),
        cost_estimate=cost,
    )(x_c, w1_t, b1_p, w2_t, b2_p)

    return out[:N, :E].reshape(orig_shape)


def _ref_ffn(x, w1, b1, w2, b2, cdt=jnp.bfloat16):
    """Pure-JAX reference with numerics matched to the kernel
    (bf16 inputs/weights, f32 accumulation, f32 bias/ReLU)."""
    f32 = jnp.float32
    xf = x.astype(cdt).astype(f32)
    w1f = w1.astype(cdt).astype(f32)
    w2f = w2.astype(cdt).astype(f32)
    h = jnp.maximum(xf @ w1f.T + b1.astype(f32), 0.0)
    h = h.astype(cdt).astype(f32)
    return (h @ w2f.T + b2.astype(f32)).astype(x.dtype)


if __name__ == "__main__":
    # Small shapes consistent with the module: (batch, seq, embed_dim).
    # embed_dim / ff_dim chosen as multiples of 128 -> lane-dense tiles.
    batch, seq, embed_dim, ff_dim = 2, 8, 128, 256

    key = jax.random.PRNGKey(0)
    kx, k1, k2, k3, k4 = jax.random.split(key, 5)

    x = jax.random.normal(kx, (batch, seq, embed_dim), dtype=jnp.float32)

    # Deterministic parameter init (PyTorch Linear-style uniform bounds).
    bound1 = 1.0 / (embed_dim ** 0.5)
    w1 = jax.random.uniform(k1, (ff_dim, embed_dim), jnp.float32, -bound1, bound1)
    b1 = jax.random.uniform(k2, (ff_dim,), jnp.float32, -bound1, bound1)
    bound2 = 1.0 / (ff_dim ** 0.5)
    w2 = jax.random.uniform(k3, (embed_dim, ff_dim), jnp.float32, -bound2, bound2)
    b2 = jax.random.uniform(k4, (embed_dim,), jnp.float32, -bound2, bound2)

    params = prepare_ffn_params(w1, b1, w2, b2)   # one-time glue, hoisted
    out = jax.block_until_ready(feed_forward_network(x, params))
    ref = _ref_ffn(x, w1, b1, w2, b2)
    assert out.shape == x.shape
    assert jnp.allclose(out, ref, atol=1e-2, rtol=1e-2), "mismatch vs reference"

    # Second check: exercises padding (E, F, N not multiples of the tiles),
    # multiple row tiles and multi-step F accumulation.
    e2, f2 = 96, 200
    x2 = jax.random.normal(kx, (3, 50, e2), dtype=jnp.float32)
    w1b = jax.random.uniform(k1, (f2, e2), jnp.float32, -0.1, 0.1)
    b1b = jax.random.uniform(k2, (f2,), jnp.float32, -0.1, 0.1)
    w2b = jax.random.uniform(k3, (e2, f2), jnp.float32, -0.1, 0.1)
    b2b = jax.random.uniform(k4, (e2,), jnp.float32, -0.1, 0.1)
    params2 = prepare_ffn_params(w1b, b1b, w2b, b2b)
    out2 = jax.block_until_ready(
        feed_forward_network(x2, params2, row_tile=128, f_tile=128))
    ref2 = _ref_ffn(x2, w1b, b1b, w2b, b2b)
    assert out2.shape == x2.shape
    assert jnp.allclose(out2, ref2, atol=1e-2, rtol=1e-2), "mismatch (padded path)"

    print("KERNEL_OK")
</pallas_src>

<mosaic_0001>
module attributes {stable_mosaic.version = 11 : i64} {
  func.func @ffn_kernel(%arg0: i32, %arg1: i32, %arg2: memref<128x128xbf16, #tpu.memory_space<vmem>>, %arg3: memref<128x256xbf16, #tpu.memory_space<vmem>>, %arg4: memref<1x256xf32, #tpu.memory_space<vmem>>, %arg5: memref<256x128xbf16, #tpu.memory_space<vmem>>, %arg6: memref<1x128xf32, #tpu.memory_space<vmem>>, %arg7: memref<128x128xf32, #tpu.memory_space<vmem>>, %arg8: memref<128x128xf32, #tpu.memory_space<vmem>>) attributes {dimension_semantics = [#tpu.dimension_semantics<parallel>, #tpu.dimension_semantics<arbitrary>], iteration_bounds = array<i64: 1, 1>, scalar_prefetch = 0 : i64, scratch_operands = 1 : i64, tpu.core_type = #tpu.core_type<tc>, window_params = [{transform_indices = @transform_0, window_bounds = array<i64: 128, 128>}, {transform_indices = @transform_1, window_bounds = array<i64: 128, 256>}, {transform_indices = @transform_2, window_bounds = array<i64: 1, 256>}, {transform_indices = @transform_3, window_bounds = array<i64: 256, 128>}, {pipeline_mode = #tpu.pipeline_mode<synchronous>, transform_indices = @transform_4, window_bounds = array<i64: 1, 128>}, {transform_indices = @transform_5, window_bounds = array<i64: 128, 128>}]} {
    %c0_i32 = arith.constant 0 : i32
    %0 = arith.cmpi eq, %arg1, %c0_i32 : i32
    %1 = arith.extui %0 : i1 to i32
    %c0_i32_0 = arith.constant 0 : i32
    %2 = arith.cmpi ne, %1, %c0_i32_0 : i32
    scf.if %2 {
      %cst_16 = arith.constant 0.000000e+00 : f32
      %20 = vector.broadcast %cst_16 : f32 to vector<128x128xf32>
      %c0_17 = arith.constant 0 : index
      %c0_18 = arith.constant 0 : index
      %21 = vector.load %arg8[%c0_17, %c0_18] : memref<128x128xf32, #tpu.memory_space<vmem>>, vector<128x128xf32>
      tpu.vector_store %arg8[%c0_17, %c0_18], %20 {strides = array<i32>} : memref<128x128xf32, #tpu.memory_space<vmem>>, vector<128x128xf32>,
    } else {
    }
    %c0 = arith.constant 0 : index
    %c0_1 = arith.constant 0 : index
    %3 = vector.load %arg2[%c0, %c0_1] : memref<128x128xbf16, #tpu.memory_space<vmem>>, vector<128x128xbf16>
    %c0_2 = arith.constant 0 : index
    %c0_3 = arith.constant 0 : index
    %4 = vector.load %arg3[%c0_2, %c0_3] : memref<128x256xbf16, #tpu.memory_space<vmem>>, vector<128x256xbf16>
    %cst = arith.constant dense<0.000000e+00> : vector<128x256xf32>
    %5 = tpu.matmul %3, %4, %cst {dimension_numbers = #tpu.dot_dimension_numbers<[1], [0], [0], [1], [0, 0, 1, 1], [], []>} : vector<128x128xbf16>, vector<128x256xbf16>, vector<128x256xf32> -> vector<128x256xf32>
    %c0_4 = arith.constant 0 : index
    %c0_5 = arith.constant 0 : index
    %6 = vector.load %arg4[%c0_4, %c0_5] : memref<1x256xf32, #tpu.memory_space<vmem>>, vector<1x256xf32>
    %7 = vector.broadcast %6 : vector<1x256xf32> to vector<128x256xf32>
    %8 = arith.addf %5, %7 : vector<128x256xf32>
    %cst_6 = arith.constant 0.000000e+00 : f32
    %9 = vector.broadcast %cst_6 : f32 to vector<128x256xf32>
    %10 = arith.maximumf %8, %9 : vector<128x256xf32>
    %c0_7 = arith.constant 0 : index
    %c0_8 = arith.constant 0 : index
    %11 = vector.load %arg8[%c0_7, %c0_8] : memref<128x128xf32, #tpu.memory_space<vmem>>, vector<128x128xf32>
    %12 = arith.truncf %10 : vector<128x256xf32> to vector<128x256xbf16>
    %c0_9 = arith.constant 0 : index
    %c0_10 = arith.constant 0 : index
    %13 = vector.load %arg5[%c0_9, %c0_10] : memref<256x128xbf16, #tpu.memory_space<vmem>>, vector<256x128xbf16>
    %cst_11 = arith.constant dense<0.000000e+00> : vector<128x128xf32>
    %14 = tpu.matmul %12, %13, %cst_11 {dimension_numbers = #tpu.dot_dimension_numbers<[1], [0], [0], [1], [0, 0, 1, 1], [], []>} : vector<128x256xbf16>, vector<256x128xbf16>, vector<128x128xf32> -> vector<128x128xf32>
    %15 = arith.addf %11, %14 : vector<128x128xf32>
    %c0_12 = arith.constant 0 : index
    %c0_13 = arith.constant 0 : index
    %16 = vector.load %arg8[%c0_12, %c0_13] : memref<128x128xf32, #tpu.memory_space<vmem>>, vector<128x128xf32>
    tpu.vector_store %arg8[%c0_12, %c0_13], %15 {strides = array<i32>} : memref<128x128xf32, #tpu.memory_space<vmem>>, vector<128x128xf32>,
    %c0_i32_14 = arith.constant 0 : i32
    %17 = arith.cmpi eq, %arg1, %c0_i32_14 : i32
    %18 = arith.extui %17 : i1 to i32
    %c0_i32_15 = arith.constant 0 : i32
    %19 = arith.cmpi ne, %18, %c0_i32_15 : i32
    scf.if %19 {
      %c0_16 = arith.constant 0 : index
      %c0_17 = arith.constant 0 : index
      %20 = vector.load %arg8[%c0_16, %c0_17] : memref<128x128xf32, #tpu.memory_space<vmem>>, vector<128x128xf32>
      %c0_18 = arith.constant 0 : index
      %c0_19 = arith.constant 0 : index
      %21 = vector.load %arg6[%c0_18, %c0_19] : memref<1x128xf32, #tpu.memory_space<vmem>>, vector<1x128xf32>
      %22 = vector.broadcast %21 : vector<1x128xf32> to vector<128x128xf32>
      %23 = arith.addf %20, %22 : vector<128x128xf32>
      %c0_20 = arith.constant 0 : index
      %c0_21 = arith.constant 0 : index
      %24 = vector.load %arg7[%c0_20, %c0_21] : memref<128x128xf32, #tpu.memory_space<vmem>>, vector<128x128xf32>
      tpu.vector_store %arg7[%c0_20, %c0_21], %23 {strides = array<i32>} : memref<128x128xf32, #tpu.memory_space<vmem>>, vector<128x128xf32>,
    } else {
    }
    return
  }
  func.func @transform_0(%arg0: i32, %arg1: i32) -> (i32, i32) {
    %c0_i32 = arith.constant 0 : i32
    %c0_i32_0 = arith.constant 0 : i32
    return %arg0, %c0_i32 : i32, i32
  }
  func.func @transform_1(%arg0: i32, %arg1: i32) -> (i32, i32) {
    %c0_i32 = arith.constant 0 : i32
    %c0_i32_0 = arith.constant 0 : i32
    return %c0_i32, %arg1 : i32, i32
  }
  func.func @transform_2(%arg0: i32, %arg1: i32) -> (i32, i32) {
    %c0_i32 = arith.constant 0 : i32
    %c0_i32_0 = arith.constant 0 : i32
    return %c0_i32, %arg1 : i32, i32
  }
  func.func @transform_3(%arg0: i32, %arg1: i32) -> (i32, i32) {
    %c0_i32 = arith.constant 0 : i32
    %c0_i32_0 = arith.constant 0 : i32
    return %arg1, %c0_i32 : i32, i32
  }
  func.func @transform_4(%arg0: i32, %arg1: i32) -> (i32, i32) {
    %c0_i32 = arith.constant 0 : i32
    %c0_i32_0 = arith.constant 0 : i32
    %c0_i32_1 = arith.constant 0 : i32
    return %c0_i32, %c0_i32_0 : i32, i32
  }
  func.func @transform_5(%arg0: i32, %arg1: i32) -> (i32, i32) {
    %c0_i32 = arith.constant 0 : i32
    %c0_i32_0 = arith.constant 0 : i32
    return %arg0, %c0_i32 : i32, i32
  }
}

</mosaic_0001>

<bundles_post_ra>
// kernel: tpu_custom_call.1
= control target key start
LH: loop header
LB: loop body
LE: loop exit
PB: predicated region body
PF: predicated region fallthrough
CT: control target
= control target key end

     0   :  { %10 = vsyncpa [#allocation4], 0  ;;  %s1219_s0 = inlined_call_operand.hbm [shape: bf16[128,128], index: 0, kind: input, shape index: {}]   ;;  %s1220_s1 = inlined_call_operand.hbm [shape: bf16[128,256], index: 1, kind: input, shape index: {}]   ;;  %s1221_s2 = inlined_call_operand.hbm [shape: f32[1,256], index: 2, kind: input, shape index: {}]   ;;  %s1222_s3 = inlined_call_operand.hbm [shape: bf16[256,128], index: 3, kind: input, shape index: {}]   ;;  %s1223_s4 = inlined_call_operand.vmem [shape: f32[1,128], index: 4, kind: input, shape index: {}]   ;;  %s1224_s5 = inlined_call_operand.hbm [shape: f32[128,128], index: 5, kind: output, shape index: {}]  }
   0x1   :  { %11 = vsyncpa [#allocation7], 0 }
   0x2   :  { %12 = vsyncpa [#allocation10], 0  ;;  %s31_s20 = sshll.u32 %s1220_s1, 4  ;;  %s32_s20 = int_to_ptr.hbm [resolvable:$true] %s31_s20 }
   0x3   :  { %13 = vsyncpa [#allocation5], 0  ;;  %s1102_s21 = smov [#allocation6]   ;;  %s18_s25 = sshll.u32 %s1219_s0, 4  ;;  %s19_s25 = int_to_ptr.hbm [resolvable:$true] %s18_s25 }
   0x4   :  { %s33_s22 = sshll.u32 %s1102_s21, 4  ;;  %s1103_s26 = smov 128   ;;  %s34_s22 = int_to_ptr.vmem [resolvable:$true] %s33_s22 }
   0x5   :  { %s1104_s27 = smov 8   ;;  %s1105_s28 = smov [#allocation3]  }
   0x6   :  { %39 = dma.hbm_to_vmem [thread:$0]  %s32_s20, 2048, %s34_s22, [#allocation7], %s1103_s26, %s1103_s26, %s1104_s27  }
   0x7   :  { %s20_s29 = sshll.u32 %s1105_s28, 4  ;;  %s1106_s1 = smov 64   ;;  %s21_s29 = int_to_ptr.vmem [resolvable:$true] %s20_s29 }
   0x8   :  { %s1107_s30 = smov 4   ;;  %s45_s8 = sshll.u32 %s1221_s2, 4  ;;  %s46_s8 = int_to_ptr.hbm [resolvable:$true] %s45_s8 }
   0x9   :  { %26 = dma.hbm_to_vmem [thread:$0]  %s19_s25, 1024, %s21_s29, [#allocation4], %s1106_s1, %s1106_s1, %s1107_s30  }
   0xa   :  { %s1108_s9 = smov [#allocation8]   ;;  %s55_s12 = sshll.u32 %s1222_s3, 4  ;;  %s56_s12 = int_to_ptr.hbm [resolvable:$true] %s55_s12 }
   0xb   :  { %s47_s0 = sshll.u32 %s1108_s9, 4  ;;  %s1109_s13 = smov [#allocation9]   ;;  %s48_s0 = int_to_ptr.vmem [resolvable:$true] %s47_s0 }
   0xc   :  { %50 = dma.hbm_to_vmem [thread:$0]  %s46_s8, 32, %s48_s0, [#allocation7]  }
   0xd   :  { %s57_s14 = sshll.u32 %s1109_s13, 4  ;;  %s58_s14 = int_to_ptr.vmem [resolvable:$true] %s57_s14 }
   0xe   :  { %63 = dma.hbm_to_vmem [thread:$0]  %s56_s12, 2048, %s58_s14, [#allocation10], %s1106_s1, %s1106_s1, %s1107_s30  }
   0xf   :  { %1094 = dma.done.wait [#allocation4], 1024  }
  0x10   :  { %1095 = vsyncadd [#allocation4], 4294966272 }
  0x11   :  { %1096 = dma.done.wait [#allocation7], 2080  }
  0x12   :  { %1097 = vsyncadd [#allocation7], 4294965216 }
  0x13   :  { %1098 = dma.done.wait [#allocation10], 2048  }
  0x14   :  { %1099 = vsyncadd [#allocation10], 4294965248  ;;  %v854_v0 = vld [vmem:[#allocation6 + $0x70] sm:$0xf]  ;;  %v947_v1 = vld [vmem:[#allocation6 + $0x74] sm:$0xf0] }
  0x15   :  { %v946_v2 = vld [vmem:[#allocation6 + $0x74] sm:$0xf]  ;;  %v855_v3 = vor.u32 %v947_v1, %v854_v0  ;;  %v856_v4 = vld [vmem:[#allocation6 + $0x78] sm:$0xf0]  ;;  %v846_v5 = vld [vmem:[#allocation6 + $0x60] sm:$0xf] }
  0x16   :  { %v945_v6 = vld [vmem:[#allocation6 + $0x64] sm:$0xf0]  ;;  %v859_v7 = vor.u32 %v946_v2, %v856_v4  ;;  %v944_v8 = vld [vmem:[#allocation6 + $0x64] sm:$0xf]  ;;  %v848_v9 = vld [vmem:[#allocation6 + $0x68] sm:$0xf0] }
  0x17   :  { %268 = vmatpush.bf16.msra.mxu0 %v855_v3  ;;  %v847_v10 = vor.u32 %v945_v6, %v846_v5  ;;  %v851_v11 = vor.u32 %v944_v8, %v848_v9  ;;  %v838_v12 = vld [vmem:[#allocation6 + $0x50] sm:$0xf]  ;;  %v943_v13 = vld [vmem:[#allocation6 + $0x54] sm:$0xf0]  ;;  %v942_v14 = vld [vmem:[#allocation6 + $0x54] sm:$0xf] }
  0x18   :  { %317 = vmatpush.bf16.msra.mxu1 %v859_v7  ;;  %v840_v15 = vld [vmem:[#allocation6 + $0x58] sm:$0xf0]  ;;  %v839_v16 = vor.u32 %v943_v13, %v838_v12  ;;  %v830_v18 = vld [vmem:[#allocation6 + $0x40] sm:$0xf]  ;;  %v941_v19 = vld [vmem:[#allocation6 + $0x44] sm:$0xf0] }
  0x19   :  { %v843_v17 = vor.u32 %v942_v14, %v840_v15  ;;  %v940_v20 = vld [vmem:[#allocation6 + $0x44] sm:$0xf]  ;;  %v832_v21 = vld [vmem:[#allocation6 + $0x48] sm:$0xf0]  ;;  %v831_v22 = vor.u32 %v941_v19, %v830_v18  ;;  %v822_v24 = vld [vmem:[#allocation6 + $0x30] sm:$0xf] }
  0x1a   :  { %v835_v23 = vor.u32 %v940_v20, %v832_v21  ;;  %v939_v25 = vld [vmem:[#allocation6 + $0x34] sm:$0xf0]  ;;  %v938_v26 = vld [vmem:[#allocation6 + $0x34] sm:$0xf]  ;;  %v824_v27 = vld [vmem:[#allocation6 + $0x38] sm:$0xf0] }
  0x1b   :  { %269 = vmatpush.bf16.msra.mxu0 %v847_v10  ;;  %v823_v28 = vor.u32 %v939_v25, %v822_v24  ;;  %v827_v29 = vor.u32 %v938_v26, %v824_v27  ;;  %v814_v30 = vld [vmem:[#allocation6 + $0x20] sm:$0xf]  ;;  %v937_v31 = vld [vmem:[#allocation6 + $0x24] sm:$0xf0]  ;;  %v936_v32 = vld [vmem:[#allocation6 + $0x24] sm:$0xf] }
  0x1c   :  { %318 = vmatpush.bf16.msra.mxu1 %v851_v11  ;;  %v816_v33 = vld [vmem:[#allocation6 + $0x28] sm:$0xf0]  ;;  %v815_v34 = vor.u32 %v937_v31, %v814_v30  ;;  %v806_v36 = vld [vmem:[#allocation6 + $0x10] sm:$0xf]  ;;  %v935_v37 = vld [vmem:[#allocation6 + $0x14] sm:$0xf0] }
  0x1d   :  { %v819_v35 = vor.u32 %v936_v32, %v816_v33  ;;  %v934_v38 = vld [vmem:[#allocation6 + $0x14] sm:$0xf]  ;;  %v808_v39 = vld [vmem:[#allocation6 + $0x18] sm:$0xf0]  ;;  %v807_v40 = vor.u32 %v935_v37, %v806_v36  ;;  %v798_v42 = vld [vmem:[#allocation6] sm:$0xf] }
  0x1e   :  { %v811_v41 = vor.u32 %v934_v38, %v808_v39  ;;  %v933_v43 = vld [vmem:[#allocation6 + $0x4] sm:$0xf0]  ;;  %v932_v44 = vld [vmem:[#allocation6 + $0x4] sm:$0xf]  ;;  %v800_v45 = vld [vmem:[#allocation6 + $0x8] sm:$0xf0] }
  0x1f   :  { %270 = vmatpush.bf16.msra.mxu0 %v839_v16  ;;  %v799_v46 = vor.u32 %v933_v43, %v798_v42  ;;  %v803_v47 = vor.u32 %v932_v44, %v800_v45  ;;  %v924_v48 = vld [vmem:[#allocation3] sm:$0xff]  ;;  %v925_v49 = vld [vmem:[#allocation3 + $0x8] sm:$0xff]  ;;  %v926_v50 = vld [vmem:[#allocation3 + $0x10] sm:$0xff]  ;;  %s749_s18 = sshll.u32 %s1224_s5, 4  ;;  %s750_s18 = int_to_ptr.hbm [resolvable:$true] %s749_s18 }
  0x20   :  { %319 = vmatpush.bf16.msra.mxu1 %v843_v17  ;;  %v927_v51 = vld [vmem:[#allocation3 + $0x18] sm:$0xff]  ;;  %v928_v52 = vld [vmem:[#allocation3 + $0x20] sm:$0xff]  ;;  %v929_v55 = vld [vmem:[#allocation3 + $0x28] sm:$0xff] }
  0x21   :  { %v955_v53 = vld [vmem:[#allocation9 + $0x38] sm:$0xff]  ;;  %v954_v56 = vld [vmem:[#allocation9 + $0x30] sm:$0xff]  ;;  %v953_v58 = vld [vmem:[#allocation9 + $0x28] sm:$0xff] }
  0x22   :  { %v963_v54 = vld [vmem:[#allocation9 + $0x78] sm:$0xff]  ;;  %558 = vmatpush.bf16.msra.mxu2 %v955_v53  ;;  %v962_v57 = vld [vmem:[#allocation9 + $0x70] sm:$0xff]  ;;  %v961_v59 = vld [vmem:[#allocation9 + $0x68] sm:$0xff] }
  0x23   :  { %271 = vmatpush.bf16.msra.mxu0 %v831_v22  ;;  %607 = vmatpush.bf16.msra.mxu3 %v963_v54  ;;  %v952_v60 = vld [vmem:[#allocation9 + $0x20] sm:$0xff]  ;;  %v930_v62 = vld [vmem:[#allocation3 + $0x30] sm:$0xff]  ;;  %v951_v63 = vld [vmem:[#allocation9 + $0x18] sm:$0xff] }
  0x24   :  { %320 = vmatpush.bf16.msra.mxu1 %v835_v23  ;;  %v960_v61 = vld [vmem:[#allocation9 + $0x60] sm:$0xff]  ;;  %v959_v0 = vld [vmem:[#allocation9 + $0x58] sm:$0xff]  ;;  %v950_v1 = vld [vmem:[#allocation9 + $0x10] sm:$0xff] }
  0x25   :  { %v958_v2 = vld [vmem:[#allocation9 + $0x50] sm:$0xff]  ;;  %v949_v3 = vld [vmem:[#allocation9 + $0x8] sm:$0xff]  ;;  %v948_v5 = vld [vmem:[#allocation9] sm:$0xff] }
  0x26   :  { %559 = vmatpush.bf16.msra.mxu2 %v954_v56  ;;  %v957_v4 = vld [vmem:[#allocation9 + $0x48] sm:$0xff]  ;;  %v956_v6 = vld [vmem:[#allocation9 + $0x40] sm:$0xff]  ;;  %v931_v7 = vld [vmem:[#allocation3 + $0x38] sm:$0xff] }
  0x27   :  { %272 = vmatpush.bf16.msra.mxu0 %v823_v28  ;;  %608 = vmatpush.bf16.msra.mxu3 %v962_v57  ;;  %v134_v8 = vld [vmem:[#allocation8] sm:$0x3] }
  0x28   :  { %321 = vmatpush.bf16.msra.mxu1 %v827_v29  ;;  %v1156_v11 = vperm.slane %v134_v8, 0  ;;  %v1158_v12 = vperm.slane %v134_v8, 1 }
  0x2a   :  { %560 = vmatpush.bf16.msra.mxu2 %v953_v58 }
  0x2b   :  { %273 = vmatpush.bf16.msra.mxu0 %v815_v34  ;;  %609 = vmatpush.bf16.msra.mxu3 %v961_v59 }
  0x2c   :  { %322 = vmatpush.bf16.msra.mxu1 %v819_v35 }
  0x2e   :  { %561 = vmatpush.bf16.msra.mxu2 %v952_v60 }
  0x2f   :  { %274 = vmatpush.bf16.msra.mxu0 %v807_v40  ;;  %610 = vmatpush.bf16.msra.mxu3 %v960_v61 }
  0x30   :  { %323 = vmatpush.bf16.msra.mxu1 %v811_v41 }
  0x32   :  { %562 = vmatpush.bf16.msra.mxu2 %v951_v63 }
  0x33   :  { %275 = vmatpush.bf16.msra.mxu0 %v799_v46  ;;  %611 = vmatpush.bf16.msra.mxu3 %v959_v0 }
  0x34   :  { %324 = vmatpush.bf16.msra.mxu1 %v803_v47 }
  0x36   :  { %276 = vmatmul.bf16.vlgmr.msra.gmra.mxu0 %v924_v48  ;;  %563 = vmatpush.bf16.msra.mxu2 %v950_v1 }
  0x37   :  { %325 = vmatmul.bf16.vlgmr.msra.gmra.mxu1 %v924_v48  ;;  %612 = vmatpush.bf16.msra.mxu3 %v958_v2 }
  0x3a   :  { %564 = vmatpush.bf16.msra.mxu2 %v949_v3 }
  0x3b   :  { %613 = vmatpush.bf16.msra.mxu3 %v957_v4 }
  0x3e   :  { %565 = vmatpush.bf16.msra.mxu2 %v948_v5 }
  0x3f   :  { %614 = vmatpush.bf16.msra.mxu3 %v956_v6 }
  0x46   :  { %281 = vmatmul.bf16.gmra.mxu0 %v925_v49 }
  0x47   :  { %330 = vmatmul.bf16.gmra.mxu1 %v925_v49 }
  0x56   :  { %286 = vmatmul.bf16.gmra.mxu0 %v926_v50 }
  0x57   :  { %335 = vmatmul.bf16.gmra.mxu1 %v926_v50 }
  0x66   :  { %291 = vmatmul.bf16.gmra.mxu0 %v927_v51 }
  0x67   :  { %340 = vmatmul.bf16.gmra.mxu1 %v927_v51 }
  0x76   :  { %296 = vmatmul.bf16.gmra.mxu0 %v928_v52 }
  0x77   :  { %345 = vmatmul.bf16.gmra.mxu1 %v928_v52 }
  0x86   :  { %301 = vmatmul.bf16.gmra.mxu0 %v929_v55 }
  0x87   :  { %350 = vmatmul.bf16.gmra.mxu1 %v929_v55 }
  0x96   :  { %306 = vmatmul.bf16.gmra.mxu0 %v930_v62 }
  0x97   :  { %355 = vmatmul.bf16.gmra.mxu1 %v930_v62 }
  0xa6   :  { %311 = vmatmul.bf16.gmra.mxu0 %v931_v7 }
  0xa7   :  { %360 = vmatmul.bf16.gmra.mxu1 %v931_v7 }
  0xb3   :  { %v277_v9 = vpop.f32.mrf.mxu0 }
  0xb4   :  { %v326_v10 = vpop.f32.mrf.mxu1  ;;  %v278_v13 = vadd.f32 %v277_v9, %v1156_v11 }
  0xb5   :  { %v327_v14 = vadd.f32 %v326_v10, %v1158_v12 }
  0xb6   :  { %v366_v19 = vmax.f32 %v278_v13, 0.0 }
  0xb7   :  { %v367_v21 = vmax.f32 %v327_v14, 0.0 }
  0xbb   :  { %v279_v15 = vpop.f32.mrf.mxu0 }
  0xbc   :  { %v280_v16 = vadd.f32 %v279_v15, %v1156_v11  ;;  %v328_v17 = vpop.f32.mrf.mxu1 }
  0xbd   :  { %v329_v18 = vadd.f32 %v328_v17, %v1158_v12 }
  0xbe   :  { %v368_v20 = vmax.f32 %v280_v16, 0.0 }
  0xbf   :  { %v369_v22 = vmax.f32 %v329_v18, 0.0 }
  0xc0   :  { %v414_v23 = vpack.c.bf16 %v368_v20, %v366_v19 }
  0xc1   :  { %v415_v24 = vpack.c.bf16 %v369_v22, %v367_v21 }
  0xc2   :  { %566 = vmatmul.bf16.vlgmr.msra.gmra.mxu2 %v414_v23 }
  0xc3   :  { %615 = vmatmul.bf16.vlgmr.msra.gmra.mxu3 %v415_v24  ;;  %v282_v25 = vpop.f32.mrf.mxu0 }
  0xc4   :  { %v331_v26 = vpop.f32.mrf.mxu1  ;;  %v283_v27 = vadd.f32 %v282_v25, %v1156_v11 }
  0xc5   :  { %v332_v28 = vadd.f32 %v331_v26, %v1158_v12 }
  0xc6   :  { %v370_v33 = vmax.f32 %v283_v27, 0.0 }
  0xc7   :  { %v371_v35 = vmax.f32 %v332_v28, 0.0 }
  0xcb   :  { %v284_v29 = vpop.f32.mrf.mxu0 }
  0xcc   :  { %v285_v30 = vadd.f32 %v284_v29, %v1156_v11  ;;  %v333_v31 = vpop.f32.mrf.mxu1 }
  0xcd   :  { %v334_v32 = vadd.f32 %v333_v31, %v1158_v12 }
  0xce   :  { %v372_v34 = vmax.f32 %v285_v30, 0.0 }
  0xcf   :  { %v373_v36 = vmax.f32 %v334_v32, 0.0 }
  0xd0   :  { %v416_v37 = vpack.c.bf16 %v372_v34, %v370_v33 }
  0xd1   :  { %v417_v38 = vpack.c.bf16 %v373_v36, %v371_v35 }
  0xd2   :  { %571 = vmatmul.bf16.gmra.mxu2 %v416_v37 }
  0xd3   :  { %620 = vmatmul.bf16.gmra.mxu3 %v417_v38  ;;  %v287_v39 = vpop.f32.mrf.mxu0 }
  0xd4   :  { %v336_v40 = vpop.f32.mrf.mxu1  ;;  %v288_v41 = vadd.f32 %v287_v39, %v1156_v11 }
  0xd5   :  { %v337_v42 = vadd.f32 %v336_v40, %v1158_v12 }
  0xd6   :  { %v374_v47 = vmax.f32 %v288_v41, 0.0 }
  0xd7   :  { %v375_v49 = vmax.f32 %v337_v42, 0.0 }
  0xdb   :  { %v289_v43 = vpop.f32.mrf.mxu0 }
  0xdc   :  { %v290_v44 = vadd.f32 %v289_v43, %v1156_v11  ;;  %v338_v45 = vpop.f32.mrf.mxu1 }
  0xdd   :  { %v339_v46 = vadd.f32 %v338_v45, %v1158_v12 }
  0xde   :  { %v376_v48 = vmax.f32 %v290_v44, 0.0 }
  0xdf   :  { %v377_v50 = vmax.f32 %v339_v46, 0.0 }
  0xe0   :  { %v418_v51 = vpack.c.bf16 %v376_v48, %v374_v47 }
  0xe1   :  { %v419_v52 = vpack.c.bf16 %v377_v50, %v375_v49 }
  0xe2   :  { %576 = vmatmul.bf16.gmra.mxu2 %v418_v51 }
  0xe3   :  { %625 = vmatmul.bf16.gmra.mxu3 %v419_v52  ;;  %v292_v53 = vpop.f32.mrf.mxu0 }
  0xe4   :  { %v341_v54 = vpop.f32.mrf.mxu1  ;;  %v293_v55 = vadd.f32 %v292_v53, %v1156_v11 }
  0xe5   :  { %v342_v56 = vadd.f32 %v341_v54, %v1158_v12 }
  0xe6   :  { %v378_v61 = vmax.f32 %v293_v55, 0.0 }
  0xe7   :  { %v379_v63 = vmax.f32 %v342_v56, 0.0 }
  0xeb   :  { %v294_v57 = vpop.f32.mrf.mxu0 }
  0xec   :  { %v295_v58 = vadd.f32 %v294_v57, %v1156_v11  ;;  %v343_v59 = vpop.f32.mrf.mxu1 }
  0xed   :  { %v344_v60 = vadd.f32 %v343_v59, %v1158_v12 }
  0xee   :  { %v380_v62 = vmax.f32 %v295_v58, 0.0 }
  0xef   :  { %v381_v0 = vmax.f32 %v344_v60, 0.0 }
  0xf0   :  { %v420_v1 = vpack.c.bf16 %v380_v62, %v378_v61  ;;  %v1195_v62 = vld [vmem:[%s1223_s4] ss:$0 sm:$0xff]  ;;  %s1110_s4 = smov [#allocation11]  }
  0xf1   :  { %v421_v2 = vpack.c.bf16 %v381_v0, %v379_v63  ;;  %s747_s15 = sshll.u32 %s1110_s4, 4  ;;  %s748_s15 = int_to_ptr.vmem [resolvable:$true] %s747_s15 }
  0xf2   :  { %581 = vmatmul.bf16.gmra.mxu2 %v420_v1 }
  0xf3   :  { %630 = vmatmul.bf16.gmra.mxu3 %v421_v2  ;;  %v297_v3 = vpop.f32.mrf.mxu0 }
  0xf4   :  { %v346_v4 = vpop.f32.mrf.mxu1  ;;  %v298_v5 = vadd.f32 %v297_v3, %v1156_v11 }
  0xf5   :  { %v347_v6 = vadd.f32 %v346_v4, %v1158_v12 }
  0xf6   :  { %v382_v13 = vmax.f32 %v298_v5, 0.0 }
  0xf7   :  { %v383_v15 = vmax.f32 %v347_v6, 0.0 }
  0xfb   :  { %v299_v7 = vpop.f32.mrf.mxu0 }
  0xfc   :  { %v300_v8 = vadd.f32 %v299_v7, %v1156_v11  ;;  %v348_v9 = vpop.f32.mrf.mxu1 }
  0xfd   :  { %v349_v10 = vadd.f32 %v348_v9, %v1158_v12 }
  0xfe   :  { %v384_v14 = vmax.f32 %v300_v8, 0.0 }
  0xff   :  { %v385_v16 = vmax.f32 %v349_v10, 0.0 }
 0x100   :  { %v422_v17 = vpack.c.bf16 %v384_v14, %v382_v13 }
 0x101   :  { %v423_v18 = vpack.c.bf16 %v385_v16, %v383_v15 }
 0x102   :  { %586 = vmatmul.bf16.gmra.mxu2 %v422_v17 }
 0x103   :  { %635 = vmatmul.bf16.gmra.mxu3 %v423_v18  ;;  %v302_v19 = vpop.f32.mrf.mxu0 }
 0x104   :  { %v351_v20 = vpop.f32.mrf.mxu1  ;;  %v303_v21 = vadd.f32 %v302_v19, %v1156_v11 }
 0x105   :  { %v352_v22 = vadd.f32 %v351_v20, %v1158_v12 }
 0x106   :  { %v386_v27 = vmax.f32 %v303_v21, 0.0 }
 0x107   :  { %v387_v29 = vmax.f32 %v352_v22, 0.0 }
 0x10b   :  { %v304_v23 = vpop.f32.mrf.mxu0 }
 0x10c   :  { %v305_v24 = vadd.f32 %v304_v23, %v1156_v11  ;;  %v353_v25 = vpop.f32.mrf.mxu1 }
 0x10d   :  { %v354_v26 = vadd.f32 %v353_v25, %v1158_v12 }
 0x10e   :  { %v388_v28 = vmax.f32 %v305_v24, 0.0 }
 0x10f   :  { %v389_v30 = vmax.f32 %v354_v26, 0.0 }
 0x110   :  { %v424_v31 = vpack.c.bf16 %v388_v28, %v386_v27 }
 0x111   :  { %v425_v32 = vpack.c.bf16 %v389_v30, %v387_v29 }
 0x112   :  { %591 = vmatmul.bf16.gmra.mxu2 %v424_v31 }
 0x113   :  { %640 = vmatmul.bf16.gmra.mxu3 %v425_v32  ;;  %v307_v33 = vpop.f32.mrf.mxu0 }
 0x114   :  { %v356_v34 = vpop.f32.mrf.mxu1  ;;  %v308_v35 = vadd.f32 %v307_v33, %v1156_v11 }
 0x115   :  { %v357_v36 = vadd.f32 %v356_v34, %v1158_v12 }
 0x116   :  { %v390_v41 = vmax.f32 %v308_v35, 0.0 }
 0x117   :  { %v391_v43 = vmax.f32 %v357_v36, 0.0 }
 0x11b   :  { %v309_v37 = vpop.f32.mrf.mxu0 }
 0x11c   :  { %v310_v38 = vadd.f32 %v309_v37, %v1156_v11  ;;  %v358_v39 = vpop.f32.mrf.mxu1 }
 0x11d   :  { %v359_v40 = vadd.f32 %v358_v39, %v1158_v12 }
 0x11e   :  { %v392_v42 = vmax.f32 %v310_v38, 0.0 }
 0x11f   :  { %v393_v44 = vmax.f32 %v359_v40, 0.0 }
 0x120   :  { %v426_v45 = vpack.c.bf16 %v392_v42, %v390_v41 }
 0x121   :  { %v427_v46 = vpack.c.bf16 %v393_v44, %v391_v43 }
 0x122   :  { %596 = vmatmul.bf16.gmra.mxu2 %v426_v45 }
 0x123   :  { %645 = vmatmul.bf16.gmra.mxu3 %v427_v46  ;;  %v312_v47 = vpop.f32.mrf.mxu0 }
 0x124   :  { %v361_v48 = vpop.f32.mrf.mxu1  ;;  %v313_v49 = vadd.f32 %v312_v47, %v1156_v11 }
 0x125   :  { %v362_v50 = vadd.f32 %v361_v48, %v1158_v12 }
 0x126   :  { %v394_v55 = vmax.f32 %v313_v49, 0.0 }
 0x127   :  { %v395_v57 = vmax.f32 %v362_v50, 0.0 }
 0x12b   :  { %v314_v51 = vpop.f32.mrf.mxu0 }
 0x12c   :  { %v315_v52 = vadd.f32 %v314_v51, %v1156_v11  ;;  %v363_v53 = vpop.f32.mrf.mxu1 }
 0x12d   :  { %v364_v54 = vadd.f32 %v363_v53, %v1158_v12 }
 0x12e   :  { %v396_v56 = vmax.f32 %v315_v52, 0.0 }
 0x12f   :  { %v397_v58 = vmax.f32 %v364_v54, 0.0 }
 0x130   :  { %v428_v59 = vpack.c.bf16 %v396_v56, %v394_v55 }
 0x131   :  { %v429_v60 = vpack.c.bf16 %v397_v58, %v395_v57 }
 0x132   :  { %601 = vmatmul.bf16.gmra.mxu2 %v428_v59 }
 0x133   :  { %650 = vmatmul.bf16.gmra.mxu3 %v429_v60 }
 0x145   :  { %v567_v61 = vpop.f32.mrf.mxu2 }
 0x146   :  { %v616_v63 = vpop.f32.mrf.mxu3 }
 0x147   :  { %v617_v0 = vadd.f32 %v616_v63, %v567_v61 }
 0x149   :  { %v711_v11 = vadd.f32 %v1195_v62, %v617_v0 }
 0x14b   :  { %727 = vst [vmem:[#allocation11] sm:$0xff] %v711_v11 }
 0x14d   :  { %v569_v12 = vpop.f32.mrf.mxu2 }
 0x14e   :  { %v618_v1 = vpop.f32.mrf.mxu3 }
 0x14f   :  { %v619_v2 = vadd.f32 %v618_v1, %v569_v12 }
 0x151   :  { %v712_v3 = vadd.f32 %v1195_v62, %v619_v2 }
 0x153   :  { %728 = vst [vmem:[#allocation11 + $0x8] sm:$0xff] %v712_v3 }
 0x155   :  { %v572_v4 = vpop.f32.mrf.mxu2 }
 0x156   :  { %v621_v5 = vpop.f32.mrf.mxu3 }
 0x157   :  { %v622_v6 = vadd.f32 %v621_v5, %v572_v4 }
 0x159   :  { %v713_v7 = vadd.f32 %v1195_v62, %v622_v6 }
 0x15b   :  { %729 = vst [vmem:[#allocation11 + $0x10] sm:$0xff] %v713_v7 }
 0x15d   :  { %v574_v8 = vpop.f32.mrf.mxu2 }
 0x15e   :  { %v623_v9 = vpop.f32.mrf.mxu3 }
 0x15f   :  { %v624_v10 = vadd.f32 %v623_v9, %v574_v8 }
 0x161   :  { %v714_v13 = vadd.f32 %v1195_v62, %v624_v10 }
 0x163   :  { %730 = vst [vmem:[#allocation11 + $0x18] sm:$0xff] %v714_v13 }
 0x165   :  { %v577_v14 = vpop.f32.mrf.mxu2 }
 0x166   :  { %v626_v15 = vpop.f32.mrf.mxu3 }
 0x167   :  { %v627_v16 = vadd.f32 %v626_v15, %v577_v14 }
 0x169   :  { %v715_v17 = vadd.f32 %v1195_v62, %v627_v16 }
 0x16b   :  { %731 = vst [vmem:[#allocation11 + $0x20] sm:$0xff] %v715_v17 }
 0x16d   :  { %v579_v18 = vpop.f32.mrf.mxu2 }
 0x16e   :  { %v628_v19 = vpop.f32.mrf.mxu3 }
 0x16f   :  { %v629_v20 = vadd.f32 %v628_v19, %v579_v18 }
 0x171   :  { %v716_v21 = vadd.f32 %v1195_v62, %v629_v20 }
 0x173   :  { %732 = vst [vmem:[#allocation11 + $0x28] sm:$0xff] %v716_v21 }
 0x175   :  { %v582_v22 = vpop.f32.mrf.mxu2 }
 0x176   :  { %v631_v23 = vpop.f32.mrf.mxu3 }
 0x177   :  { %v632_v24 = vadd.f32 %v631_v23, %v582_v22 }
 0x179   :  { %v717_v25 = vadd.f32 %v1195_v62, %v632_v24 }
 0x17b   :  { %733 = vst [vmem:[#allocation11 + $0x30] sm:$0xff] %v717_v25 }
 0x17d   :  { %v584_v26 = vpop.f32.mrf.mxu2 }
 0x17e   :  { %v633_v27 = vpop.f32.mrf.mxu3 }
 0x17f   :  { %v634_v28 = vadd.f32 %v633_v27, %v584_v26 }
 0x181   :  { %v718_v29 = vadd.f32 %v1195_v62, %v634_v28 }
 0x183   :  { %734 = vst [vmem:[#allocation11 + $0x38] sm:$0xff] %v718_v29 }
 0x185   :  { %v587_v30 = vpop.f32.mrf.mxu2 }
 0x186   :  { %v636_v31 = vpop.f32.mrf.mxu3 }
 0x187   :  { %v637_v32 = vadd.f32 %v636_v31, %v587_v30 }
 0x189   :  { %v719_v33 = vadd.f32 %v1195_v62, %v637_v32 }
 0x18b   :  { %735 = vst [vmem:[#allocation11 + $0x40] sm:$0xff] %v719_v33 }
 0x18d   :  { %v589_v34 = vpop.f32.mrf.mxu2 }
 0x18e   :  { %v638_v35 = vpop.f32.mrf.mxu3 }
 0x18f   :  { %v639_v36 = vadd.f32 %v638_v35, %v589_v34 }
 0x191   :  { %v720_v37 = vadd.f32 %v1195_v62, %v639_v36 }
 0x193   :  { %736 = vst [vmem:[#allocation11 + $0x48] sm:$0xff] %v720_v37 }
 0x195   :  { %v592_v38 = vpop.f32.mrf.mxu2 }
 0x196   :  { %v641_v39 = vpop.f32.mrf.mxu3 }
 0x197   :  { %v642_v40 = vadd.f32 %v641_v39, %v592_v38 }
 0x199   :  { %v721_v41 = vadd.f32 %v1195_v62, %v642_v40 }
 0x19b   :  { %737 = vst [vmem:[#allocation11 + $0x50] sm:$0xff] %v721_v41 }
 0x19d   :  { %v594_v42 = vpop.f32.mrf.mxu2 }
 0x19e   :  { %v643_v43 = vpop.f32.mrf.mxu3 }
 0x19f   :  { %v644_v44 = vadd.f32 %v643_v43, %v594_v42 }
 0x1a1   :  { %v722_v45 = vadd.f32 %v1195_v62, %v644_v44 }
 0x1a3   :  { %738 = vst [vmem:[#allocation11 + $0x58] sm:$0xff] %v722_v45 }
 0x1a5   :  { %v597_v46 = vpop.f32.mrf.mxu2 }
 0x1a6   :  { %v646_v47 = vpop.f32.mrf.mxu3 }
 0x1a7   :  { %v647_v48 = vadd.f32 %v646_v47, %v597_v46 }
 0x1a9   :  { %v723_v49 = vadd.f32 %v1195_v62, %v647_v48 }
 0x1ab   :  { %739 = vst [vmem:[#allocation11 + $0x60] sm:$0xff] %v723_v49 }
 0x1ad   :  { %v599_v50 = vpop.f32.mrf.mxu2 }
 0x1ae   :  { %v648_v51 = vpop.f32.mrf.mxu3 }
 0x1af   :  { %v649_v52 = vadd.f32 %v648_v51, %v599_v50 }
 0x1b1   :  { %v724_v53 = vadd.f32 %v1195_v62, %v649_v52 }
 0x1b3   :  { %740 = vst [vmem:[#allocation11 + $0x68] sm:$0xff] %v724_v53 }
 0x1b5   :  { %v602_v54 = vpop.f32.mrf.mxu2 }
 0x1b6   :  { %v651_v55 = vpop.f32.mrf.mxu3 }
 0x1b7   :  { %v652_v56 = vadd.f32 %v651_v55, %v602_v54 }
 0x1b9   :  { %v725_v57 = vadd.f32 %v1195_v62, %v652_v56 }
 0x1bb   :  { %741 = vst [vmem:[#allocation11 + $0x70] sm:$0xff] %v725_v57 }
 0x1bd   :  { %v604_v58 = vpop.f32.mrf.mxu2 }
 0x1be   :  { %v653_v59 = vpop.f32.mrf.mxu3 }
 0x1bf   :  { %v654_v60 = vadd.f32 %v653_v59, %v604_v58 }
 0x1c1   :  { %v726_v61 = vadd.f32 %v1195_v62, %v654_v60 }
 0x1c3   :  { %742 = vst [vmem:[#allocation11 + $0x78] sm:$0xff] %v726_v61 }
 0x1c4   :  { %755 = dma.vmem_to_hbm [thread:$0]  %s748_s15, 2048, %s750_s18, [#allocation5], %s1103_s26, %s1103_s26, %s1104_s27  }
 0x1c5   :  { %1100 = dma.done.wait [#allocation5], 2048  }
 0x1c6   :  { %1101 = vsyncadd [#allocation5], 4294965248 }
 0x1c7   :  { %760 = vsyncpa [#allocation4], 1 }
 0x1c8   :  { %761 = vsyncpa [#allocation7], 1 }
 0x1c9   :  { %762 = vsyncpa [#allocation10], 1 }
 0x1ca   :  { %763 = vsyncpa [#allocation5], 1 }

</bundles_post_ra>
